<compile_context>
chip_gen: v6e
topology: v6e:2x2x1
jax: 0.10.0
libtpu: 0.0.40
codegen_flags: <defaults>
</compile_context>

<pallas_src>
import functools

import jax
import jax.numpy as jnp
from jax.experimental import pallas as pl
from jax.experimental.pallas import tpu as pltpu


EPS = 1e-5
_TARGET_TILE_BYTES = 4 * 1024 * 1024  # ~4 MiB per (TT, F_pad) f32 block
_VMEM_LIMIT_BYTES = 32 * 1024 * 1024  # headroom for 2x double-buffered 4 MiB tiles


def _round_up(v, m):
    return (v + m - 1) // m * m


def _bn_stats_kernel(x_ref, stats_ref):
    # x_ref:     (1, TT, F_pad)  one row-tile of one batch element
    # stats_ref: (1, 2,  F_pad)  resident accumulator: [sum(x), sum(x*x)]
    @pl.when(pl.program_id(1) == 0)
    def _init():
        stats_ref[...] = jnp.zeros_like(stats_ref)

    x = x_ref[0].astype(jnp.float32)                   # (TT, F_pad)
    s = jnp.sum(x, axis=0, keepdims=True)              # (1, F_pad)
    sq = jnp.sum(x * x, axis=0, keepdims=True)         # (1, F_pad)
    stats_ref[0] += jnp.concatenate([s, sq], axis=0)   # (2, F_pad)


def _bn_apply_kernel(lens_ref, x_ref, scale_ref, shift_ref, o_ref, *, tt):
    # lens_ref:  (B,) int32 in SMEM (scalar prefetch)
    # x_ref:     (1, TT, F_pad)
    # scale_ref: (1, F_pad)   gamma * inv_std  (pre-folded)
    # shift_ref: (1, F_pad)   beta - mean * gamma * inv_std
    # o_ref:     (1, TT, F_pad)
    b = pl.program_id(0)
    tb = pl.program_id(1)
    seq_len = lens_ref[b]

    scale = scale_ref[...]                                  # (1, F_pad)
    shift = shift_ref[...]                                  # (1, F_pad)
    x = x_ref[0].astype(jnp.float32)                        # (TT, F_pad)
    y = x * scale + shift                                   # one mul + one add

    # Valid-timestep mask from SMEM lengths (re-zero padded positions, as
    # pack_padded_sequence would discard them downstream).
    t_idx = tb * tt + jax.lax.broadcasted_iota(jnp.int32, (tt, 1), 0)
    y = jnp.where(t_idx < seq_len, y, 0.0)

    o_ref[0] = y.astype(o_ref.dtype)


def batchnorm_packed(x_padded, lengths, gamma, beta):
    """x_padded: (B, T, F) with zeros at padding; lengths: (B,) int32.

    Returns (y_padded, lengths) -- the padded equivalent of the PackedSequence
    the PyTorch module returns.
    """
    B, T, F = x_padded.shape
    N = B * T  # GLOBAL count: padding included, exactly like the reference.

    # ---- layout padding (lane-dense F, row-tile-aligned T) ------------------
    F_pad = _round_up(F, 128)
    target_rows = max(8, ((_TARGET_TILE_BYTES // (F_pad * 4)) // 8) * 8)
    TT = min(target_rows, _round_up(T, 8))
    T_pad = _round_up(T, TT)
    n_t = T_pad // TT

    xp = x_padded
    if T_pad != T or F_pad != F:
        xp = jnp.pad(x_padded, ((0, 0), (0, T_pad - T), (0, F_pad - F)))
    gamma_p = jnp.pad(gamma.astype(jnp.float32), (0, F_pad - F),
                      constant_values=1.0)
    beta_p = jnp.pad(beta.astype(jnp.float32), (0, F_pad - F),
                     constant_values=0.0)

    # ---- pass A: per-feature sum / sumsq ------------------------------------
    stats = pl.pallas_call(
        _bn_stats_kernel,
        out_shape=jax.ShapeDtypeStruct((B, 2, F_pad), jnp.float32),
        grid_spec=pltpu.PrefetchScalarGridSpec(
            num_scalar_prefetch=0,
            grid=(B, n_t),
            in_specs=[pl.BlockSpec((1, TT, F_pad), lambda b, t: (b, t, 0))],
            out_specs=pl.BlockSpec((1, 2, F_pad), lambda b, t: (b, 0, 0)),
        ),
        compiler_params=pltpu.CompilerParams(
            dimension_semantics=("parallel", "arbitrary"),
            vmem_limit_bytes=_VMEM_LIMIT_BYTES),
    )(xp)

    # ---- finalize (tiny, plain JAX): fold params into scale / shift ---------
    stats_total = jnp.sum(stats, axis=0)                 # (2, F_pad)
    mean = stats_total[0] / N
    var = jnp.maximum(stats_total[1] / N - mean * mean, 0.0)  # biased, clamped
    inv_std = jax.lax.rsqrt(var + EPS)
    scale = (gamma_p * inv_std).reshape(1, F_pad)
    shift = (beta_p - mean * gamma_p * inv_std).reshape(1, F_pad)

    # ---- pass B: y = x * scale + shift, masked by lengths -------------------
    y_pad = pl.pallas_call(
        functools.partial(_bn_apply_kernel, tt=TT),
        out_shape=jax.ShapeDtypeStruct((B, T_pad, F_pad), x_padded.dtype),
        grid_spec=pltpu.PrefetchScalarGridSpec(
            num_scalar_prefetch=1,
            grid=(B, n_t),
            in_specs=[
                pl.BlockSpec((1, TT, F_pad), lambda b, t, lens: (b, t, 0)),
                pl.BlockSpec((1, F_pad), lambda b, t, lens: (0, 0)),
                pl.BlockSpec((1, F_pad), lambda b, t, lens: (0, 0)),
            ],
            out_specs=pl.BlockSpec((1, TT, F_pad), lambda b, t, lens: (b, t, 0)),
        ),
        compiler_params=pltpu.CompilerParams(
            dimension_semantics=("parallel", "parallel"),
            vmem_limit_bytes=_VMEM_LIMIT_BYTES),
    )(lengths.astype(jnp.int32), xp, scale, shift)

    return y_pad[:, :T, :F], lengths


def _reference(x_padded, lengths, gamma, beta):
    # Pure-JAX reference of the same semantics (BN1d training mode over the
    # padded tensor, then re-zero padding).
    B, T, F = x_padded.shape
    x = x_padded.astype(jnp.float32)
    mean = jnp.mean(x, axis=(0, 1), keepdims=True)
    var = jnp.mean((x - mean) ** 2, axis=(0, 1), keepdims=True)
    y = (x - mean) / jnp.sqrt(var + EPS) * gamma[None, None, :] + beta[None, None, :]
    mask = (jnp.arange(T)[None, :] < lengths[:, None]).astype(jnp.float32)
    return y * mask[:, :, None]


if __name__ == "__main__":
    B, T, F = 2, 8, 32  # small shapes consistent with the module's forward

    key = jax.random.PRNGKey(0)
    kx, kg, kb = jax.random.split(key, 3)
    x = jax.random.normal(kx, (B, T, F), dtype=jnp.float32)

    # Variable sequence lengths; zero out padding like pad_packed_sequence does.
    lengths = jnp.array([T, T - 3], dtype=jnp.int32)
    valid = (jnp.arange(T)[None, :] < lengths[:, None]).astype(jnp.float32)
    x = x * valid[:, :, None]

    # nn.BatchNorm1d learnable affine params (non-trivial values to exercise
    # both the scale and shift paths; default init would be weight=1, bias=0).
    gamma = 1.0 + 0.1 * jax.random.normal(kg, (F,), dtype=jnp.float32)
    beta = 0.1 * jax.random.normal(kb, (F,), dtype=jnp.float32)

    y, out_lengths = batchnorm_packed(x, lengths, gamma, beta)
    y = jax.block_until_ready(y)

    y_ref = _reference(x, lengths, gamma, beta)
    assert jnp.allclose(y, y_ref, atol=1e-4, rtol=1e-4), "mismatch vs reference"

    print("KERNEL_OK")
</pallas_src>

<mosaic_0001>
module attributes {stable_mosaic.version = 11 : i64} {
  func.func @_bn_stats_kernel(%arg0: i32, %arg1: i32, %arg2: memref<1x8x128xf32, #tpu.memory_space<vmem>>, %arg3: memref<1x2x128xf32, #tpu.memory_space<vmem>>) attributes {dimension_semantics = [#tpu.dimension_semantics<parallel>, #tpu.dimension_semantics<arbitrary>], iteration_bounds = array<i64: 2, 1>, scalar_prefetch = 0 : i64, scratch_operands = 0 : i64, tpu.core_type = #tpu.core_type<tc>, window_params = [{transform_indices = @transform_0, window_bounds = array<i64: 1, 8, 128>}, {transform_indices = @transform_1, window_bounds = array<i64: 1, 2, 128>}]} {
    %c0_i32 = arith.constant 0 : i32
    %0 = arith.cmpi eq, %arg1, %c0_i32 : i32
    %1 = arith.extui %0 : i1 to i32
    %c0_i32_0 = arith.constant 0 : i32
    %2 = arith.cmpi ne, %1, %c0_i32_0 : i32
    scf.if %2 {
      %cst_10 = arith.constant 0.000000e+00 : f32
      %17 = vector.broadcast %cst_10 : f32 to vector<1x2x128xf32>
      %c0_11 = arith.constant 0 : index
      %c0_12 = arith.constant 0 : index
      %c0_13 = arith.constant 0 : index
      %18 = vector.load %arg3[%c0_11, %c0_12, %c0_13] : memref<1x2x128xf32, #tpu.memory_space<vmem>>, vector<1x2x128xf32>
      tpu.vector_store %arg3[%c0_11, %c0_12, %c0_13], %17 {strides = array<i32>} : memref<1x2x128xf32, #tpu.memory_space<vmem>>, vector<1x2x128xf32>,
    } else {
    }
    %c0 = arith.constant 0 : index
    %c0_1 = arith.constant 0 : index
    %c0_2 = arith.constant 0 : index
    %3 = vector.load %arg2[%c0, %c0_1, %c0_2] : memref<1x8x128xf32, #tpu.memory_space<vmem>>, vector<1x8x128xf32>
    %4 = vector.shape_cast %3 : vector<1x8x128xf32> to vector<8x128xf32>
    %cst = arith.constant dense<0.000000e+00> : vector<128xf32>
    %5 = vector.multi_reduction <add>, %4, %cst [0] : vector<8x128xf32> to vector<128xf32>
    %6 = vector.shape_cast %5 : vector<128xf32> to vector<1x128xf32>
    %7 = arith.mulf %4, %4 : vector<8x128xf32>
    %cst_3 = arith.constant dense<0.000000e+00> : vector<128xf32>
    %8 = vector.multi_reduction <add>, %7, %cst_3 [0] : vector<8x128xf32> to vector<128xf32>
    %9 = vector.shape_cast %8 : vector<128xf32> to vector<1x128xf32>
    %c0_4 = arith.constant 0 : index
    %c0_5 = arith.constant 0 : index
    %c0_6 = arith.constant 0 : index
    %10 = vector.load %arg3[%c0_4, %c0_5, %c0_6] : memref<1x2x128xf32, #tpu.memory_space<vmem>>, vector<1x2x128xf32>
    %11 = vector.shape_cast %10 : vector<1x2x128xf32> to vector<2x128xf32>
    %12 = tpu.concatenate %6, %9 in 0 : vector<1x128xf32>, vector<1x128xf32> -> vector<2x128xf32>
    %13 = arith.addf %11, %12 : vector<2x128xf32>
    %c0_7 = arith.constant 0 : index
    %c0_8 = arith.constant 0 : index
    %c0_9 = arith.constant 0 : index
    %14 = vector.load %arg3[%c0_7, %c0_8, %c0_9] : memref<1x2x128xf32, #tpu.memory_space<vmem>>, vector<1x2x128xf32>
    %15 = vector.shape_cast %14 : vector<1x2x128xf32> to vector<2x128xf32>
    %16 = vector.shape_cast %13 : vector<2x128xf32> to vector<1x2x128xf32>
    tpu.vector_store %arg3[%c0_7, %c0_8, %c0_9], %16 {strides = array<i32>} : memref<1x2x128xf32, #tpu.memory_space<vmem>>, vector<1x2x128xf32>,
    return
  }
  func.func @transform_0(%arg0: i32, %arg1: i32) -> (i32, i32, i32) {
    %c0_i32 = arith.constant 0 : i32
    %c0_i32_0 = arith.constant 0 : i32
    return %arg0, %arg1, %c0_i32 : i32, i32, i32
  }
  func.func @transform_1(%arg0: i32, %arg1: i32) -> (i32, i32, i32) {
    %c0_i32 = arith.constant 0 : i32
    %c0_i32_0 = arith.constant 0 : i32
    %c0_i32_1 = arith.constant 0 : i32
    return %arg0, %c0_i32, %c0_i32_0 : i32, i32, i32
  }
}

</mosaic_0001>

<bundles_post_ra>
// kernel: tpu_custom_call.1
= control target key start
LH: loop header
LB: loop body
LE: loop exit
PB: predicated region body
PF: predicated region fallthrough
CT: control target
= control target key end

     0   :  { %6 = vsyncpa [#allocation3], 0  ;;  %s598_s0 = inlined_call_operand.hbm [shape: f32[2,8,128], index: 0, kind: input, shape index: {}]   ;;  %s599_s1 = inlined_call_operand.hbm [shape: f32[2,2,128], index: 1, kind: output, shape index: {}]  }
   0x1   :  { %8 = vsyncpa [#allocation3 + $0x1], 0 }
   0x2   :  { %9 = vsyncpa [#allocation4], 0 }
   0x3   :  { %11 = vsyncpa [#allocation4 + $0x1], 0  ;;  %s463_s6 = smov 0   ;;  %s465_s7 = smov 0  }
   0x4   :  { %s467_s8 = smov 0   ;;  %s469_s9 = smov 0  }
   0x5   :  { %s471_s10 = smov 0   ;;  %s473_s11 = smov 0  }
   0x6 LB: > { %s264_s12 = sadd.s32 4294967295, %s448_s11   ;;  %s265_s13 = sadd.s32 4294967294, %s448_s11   ;;  %s448_s11 = sphi %s473_s11, %s17_s11   ;;  %s444_s10 = sphi %s471_s10, %s611_s10   ;;  %s440_s9 = sphi %s469_s9, %s610_s9   ;;  %s436_s8 = sphi %s467_s8, %s609_s8   ;;  %s432_s7 = sphi %s465_s7, %s608_s7   ;;  %s428_s6 = sphi %s463_s6, %s607_s6  }
   0x7   : > { %s29_s14 = sadd.s32 1, %s444_s10  ;;  %s38_s15 = sadd.s32 1, %s436_s8 }
   0x8   : > { %p31_p0 = scmp.ge.s32.totalorder %s29_s14, 2  ;;  %p45_p1 = scmp.ne.s32.totalorder %s436_s8, %s432_s7 }
   0x9   : > { %p46_p2 = scmp.eq.s32.totalorder %s448_s11, 0  ;;  %p51_p3 = scmp.ne.s32.totalorder %s432_s7, %s428_s6 }
   0xa   : > { %s613_s14 = smov (%p31_p0, %s29_s14), 0  ;;  %p52_p5 = scmp.eq.s32.totalorder %s264_s12, 0 }
   0xb   : > { %p504_p4 = por %p46_p2, %p45_p1  ;;  %s33_s17 = ssub.s32 %s444_s10, %s613_s14 }
   0xc   : > { %p75_p6 = scmp.eq.s32.totalorder %s264_s12, 1  ;;  %p36_p7 = scmp.eq.s32.totalorder %s33_s17, 0 }
   0xd   : > { %p510_p8 = por %p52_p5, %p51_p3  ;;  %p81_p10 = scmp.eq.s32.totalorder %s265_s13, 1 }
   0xe   : > { %p514_p9 = por %p75_p6, %p45_p1  ;;  %p289_p13 = scmp.lt.s32.totalorder %s448_s11, 2 }
   0xf   : > { %s519_s20 = scalar_select %p36_p7, %s436_s8, %s38_s15  }
  0x10   : > { %p521_p11 = por %p81_p10, %p51_p3  ;;  %s101_s22 = sand.u32 1, %s436_s8  }
  0x11   : > { %s268_s23 = sshll.u32 %s101_s22, 3  ;;  %s269_s24 = sshll.u32 %s444_s10, 7 }
  0x12   : > { %s603_s21 = scalar_select %p521_p11, 1, 0 }
  0x13   : > { %s111_s27 = scalar_lea.hbm %s598_s0, %s269_s24  ;;  %s105_s28 = scalar_lea.vmem [#allocation2], %s268_s23 }
  0x14   : > { %s113_s29 = sshll.u32 %s105_s28, 4  ;;  %p534_p0 = pnand %p289_p13, %p504_p4  ;;  %s114_s29 = int_to_ptr.vmem [resolvable:$true] %s113_s29 }
  0x15   : > { %p270_p1 = scmp.ge.s32.totalorder %s448_s11, 1  ;;  %p118_p2 = scmp.lt.s32.totalorder %s448_s11, 3 }
  0x16   : > { %s102_s2 = scalar_lea.sflag [#allocation3], %s101_s22  ;;  %p342_p3 = pneg %p534_p0 }
  0x17   : > { %s353_s3 = scalar_lea.vmem %s114_s29, 128  ;;  %s450_s4 = smov [#allocation2]  }
  0x18   : > { %p354_p5 = scmp.ne.s32.totalorder %s114_s29, %s353_s3  ;;  %s358_s5 = sshll.u32 %s450_s4, 4  ;;  %s359_s5 = int_to_ptr.vmem [resolvable:$false] %s358_s5 }
  0x19   : > { %s360_s12 = scalar_lea.vmem %s359_s5, 256  ;;  %p361_p10 = scmp.lt.s32.totalorder %s114_s29, %s359_s5 }
  0x1a   : > { %p356_p6 = pnand %p354_p5, %p342_p3  ;;  %p362_p12 = scmp.lt.s32.totalorder %s360_s12, %s353_s3 }
  0x1c   : > { %p357_p7 = pneg %p356_p6  ;;  %p363_p4 = por %p362_p12, %p361_p10 }
  0x1e   : > { %p364_p13 = pnand %p363_p4, %p357_p7 }
  0x20   : > { %367 = shalt.err (!%p364_p13)
}
  0x21   : > { %284 = dma.hbm_to_vmem [thread:$0]  (!%p534_p0), %s111_s27, 128, %s114_s29, %s102_s2  }
  0x22   : > { %p119_p11 = pnand %p270_p1, %p118_p2 }
  0x23   : > { %s549_s13 = sand.u32 (!%p119_p11), 1, %s432_s7  }
  0x24   : > { %122 = sbr.rel (%p119_p11) target bundleno = 73 (0x49), region = 24  ;;  %s271_s15 = sshll.u32 (!%p119_p11), %s549_s13, 3 }
  0x25   : > { %s125_s16 = scalar_lea.sflag (!%p119_p11), [#allocation3], %s549_s13  ;;  %s128_s17 = scalar_lea.vmem (!%p119_p11), [#allocation2], %s271_s15 }
  0x29   : > { %419 = dma.done.wait (%p510_p8), %s125_s16, 128  }
  0x2a   : > { %421 = vsyncadd (%p510_p8), %s125_s16, 4294967168  ;;  %s272_s22 = sshll.u32 %s549_s13, 1  ;;  %v451_v0 = vmov 0.0   ;;  %v152_v1 = vld [vmem:[%s128_s17] sm:$0xff]  ;;  %vm167_vm0 = vcmask 1040384   ;;  %s274_s18 = sshll.u32 %s440_s9, 5 }
  0x2b   : > { %s146_s23 = scalar_lea.vmem [#allocation5], %s272_s22  ;;  %v153_v2 = vrot.slane %v152_v1, 4  ;;  %v159_v3 = vmul.f32 %v152_v1, %v152_v1  ;;  %s183_s27 = scalar_lea.hbm %s599_s1, %s274_s18 }
  0x2c   : > { %151 = vst [vmem:[%s146_s23] sm:$0x3] %v451_v0  ;;  %s185_s24 = sshll.u32 %s146_s23, 4  ;;  %s172_s28 = scalar_lea.sflag [#allocation4], %s549_s13  ;;  %s186_s24 = int_to_ptr.vmem [resolvable:$true] %s185_s24 }
  0x2d   : > { %v154_v4 = vadd.f32 %v153_v2, %v152_v1  ;;  %v160_v5 = vrot.slane %v159_v3, 4  ;;  %s368_s29 = scalar_lea.vmem %s186_s24, 32  ;;  %s452_s30 = smov [#allocation5]  }
  0x2e   : > { %p369_p8 = scmp.ne.s32.totalorder %s186_s24, %s368_s29  ;;  %s372_s2 = sshll.u32 %s452_s30, 4  ;;  %s373_s2 = int_to_ptr.vmem [resolvable:$false] %s372_s2 }
  0x2f   : > { %v155_v6 = vrot.slane %v154_v4, 2  ;;  %v161_v7 = vadd.f32 %v160_v5, %v159_v3  ;;  %s374_s3 = scalar_lea.vmem %s373_s2, 64  ;;  %p375_p0 = scmp.lt.s32.totalorder %s186_s24, %s373_s2 }
  0x30   : > { %p370_p11 = pnand %p369_p8, %p514_p9  ;;  %p376_p1 = scmp.lt.s32.totalorder %s374_s3, %s368_s29 }
  0x31   : > { %v156_v8 = vadd.f32 %v155_v6, %v154_v4  ;;  %v162_v9 = vrot.slane %v161_v7, 2 }
  0x32   : > { %p371_p12 = pneg %p370_p11  ;;  %p377_p2 = por %p376_p1, %p375_p0 }
  0x33   : > { %v157_v10 = vrot.slane %v156_v8, 1  ;;  %v163_v11 = vadd.f32 %v162_v9, %v161_v7  ;;  %v166_v15 = vld [vmem:[%s146_s23] sm:$0x3] }
  0x34   : > { %p378_p3 = pnand %p377_p2, %p371_p12 }
  0x35   : > { %v158_v12 = vadd.f32 %v157_v10, %v156_v8  ;;  %v164_v13 = vrot.slane %v163_v11, 1 }
  0x37   : > { %v165_v14 = vadd.f32 %v164_v13, %v163_v11 }
  0x39   : > { %v168_v16 = vsel %vm167_vm0, %v158_v12, %v165_v14 }
  0x3a   : > { %v169_v17 = vadd.f32 %v168_v16, %v166_v15 }
  0x3c   : > { %170 = vst [vmem:[%s146_s23] sm:$0x3] %v169_v17 }
  0x3d   : > { %381 = shalt.err (!%p378_p3)
}
  0x3e   : > { %s382_s9 = scalar_lea.hbm %s183_s27, 32  ;;  %s386_s12 = scalar_lea.hbm %s599_s1, 64 }
  0x3f   : > { %p383_p5 = scmp.ne.s32.totalorder %s183_s27, %s382_s9  ;;  %p387_p10 = scmp.lt.s32.totalorder %s183_s27, %s599_s1 }
  0x40   : > { %p388_p4 = scmp.lt.s32.totalorder %s386_s12, %s382_s9 }
  0x41   : > { %p384_p6 = pnand %p383_p5, %p514_p9 }
  0x42   : > { %p389_p13 = por %p388_p4, %p387_p10 }
  0x43   : > { %p385_p7 = pneg %p384_p6 }
  0x45   : > { %p390_p8 = pnand %p389_p13, %p385_p7 }
  0x47   : > { %393 = shalt.err (!%p390_p8)
}
  0x48   : > { %279 = dma.vmem_to_hbm [thread:$0]  (%p514_p9), %s186_s24, 32, %s183_s27, %s172_s28  }
  0x49 PF: > { %s197_s16 = sand.u32 1, %s428_s6   ;;  %p605_p11 = scmp.ne.s32.totalorder %s603_s21, 0 }
  0x4a   : > { %p606_p12 = scmp.ge.s32.totalorder %s448_s11, 2  ;;  %s198_s17 = scalar_lea.sflag [#allocation4], %s197_s16 }
  0x4c   : > { %p286_p0 = pnand %p606_p12, %p605_p11 }
  0x4e   : > { %p287_p1 = pneg %p286_p0 }
  0x50   : > { %423 = dma.done.wait (%p287_p1), %s198_s17, 32  }
  0x51   : > { %425 = vsyncadd (%p287_p1), %s198_s17, 4294967264  ;;  %s17_s11 = sadd.s32 1, %s448_s11   ;;  %s607_s6 = smov %s432_s7 }
  0x52   : > { %p14_p2 = scmp.ge.s32.totalorder %s17_s11, 4   ;;  %s608_s7 = smov %s436_s8 }
  0x53   : > { %s609_s8 = smov %s519_s20  ;;  %s610_s9 = smov %s444_s10 }
  0x54   : > { %s611_s10 = smov %s613_s14  ;;  %16 = sbr.rel (!%p14_p2) target bundleno = 6 (0x6), region = 73 }
  0x59   :  { %203 = vsyncpa [#allocation3], 1 }
  0x5a   :  { %205 = vsyncpa [#allocation3 + $0x1], 1 }
  0x5b   :  { %206 = vsyncpa [#allocation4], 1 }
  0x5c   :  { %208 = vsyncpa [#allocation4 + $0x1], 1 }

</bundles_post_ra>
